<compile_context>
chip_gen: v7x
topology: tpu7x:2x2x1
jax: 0.10.0
libtpu: 0.0.40
codegen_flags: <defaults>
</compile_context>

<pallas_src>
import functools

import jax
import jax.numpy as jnp
from jax.experimental import pallas as pl
from jax.experimental.pallas import tpu as pltpu


def _round_up(x, m):
    return ((x + m - 1) // m) * m


def _vmem_capacity_bytes():
    try:
        info = pltpu.get_tpu_info()
        cap = getattr(info, "vmem_capacity_bytes", None)
        if cap:
            return int(cap)
    except Exception:
        pass
    return 64 * 1024 * 1024  # conservative: v7x per-core VMEM


# --------------------------------------------------------------------------
# Kernels
# --------------------------------------------------------------------------
def _single_pass_kernel(x_ref, w_ref, b_ref, o_ref, *, inv_t):
    # x_ref: (TB, T, D) — the full temporal extent in one block.
    pooled = jnp.sum(x_ref[...].astype(jnp.float32), axis=1) * inv_t
    out = jnp.dot(pooled, w_ref[...].astype(jnp.float32),
                  preferred_element_type=jnp.float32)
    o_ref[...] = (out + b_ref[...].astype(jnp.float32)).astype(o_ref.dtype)


def _two_pass_kernel(x_ref, w_ref, b_ref, o_ref, acc_ref, *, inv_t, t_total,
                     tt, mask_t):
    # x_ref: (TB, TT, D), acc_ref: (TB, D) f32 scratch, o_ref: (TB, Cp)
    t = pl.program_id(1)

    @pl.when(t == 0)
    def _():
        acc_ref[...] = jnp.zeros_like(acc_ref)

    x = x_ref[...].astype(jnp.float32)
    if mask_t:
        # Ragged last T tile: zero out rows past the true temporal length.
        row = jax.lax.broadcasted_iota(jnp.int32, x.shape, 1)
        x = jnp.where(t * tt + row < t_total, x, 0.0)
    acc_ref[...] += jnp.sum(x, axis=1)

    @pl.when(t == pl.num_programs(1) - 1)
    def _():
        pooled = acc_ref[...] * inv_t
        out = jnp.dot(pooled, w_ref[...].astype(jnp.float32),
                      preferred_element_type=jnp.float32)
        o_ref[...] = (out + b_ref[...].astype(jnp.float32)).astype(o_ref.dtype)


# --------------------------------------------------------------------------
# Tiling
# --------------------------------------------------------------------------
def _choose_tiles(B, T, D, itemsize, feat_budget):
    # Batch tile: keep >= 2 tiles when B >= 16 so both v7x TCs get work.
    if B <= 8:
        TB = max(B, 1)
    elif B < 16:
        TB = 8
    else:
        TB = min(128, _round_up(pl.cdiv(B, 2), 8))

    def fits_single(tb):
        return 2 * tb * T * D * itemsize <= feat_budget

    if fits_single(TB):
        return TB, T, True
    # Try shrinking the batch tile before giving up on the single pass.
    tb = TB
    while tb > 8 and not fits_single(tb):
        tb = max(8, _round_up(tb // 2, 8))
    if fits_single(tb):
        return tb, T, True

    # Two-pass: reduction tile TT (multiple of 8).  If the 8-row floor would
    # overshoot the budget, shrink TB instead of silently exceeding it.
    TB = tb
    tt_cap = (feat_budget // (2 * TB * D * itemsize)) // 8 * 8
    while tt_cap < 8 and TB > 8:
        TB = max(8, TB // 2)
        tt_cap = (feat_budget // (2 * TB * D * itemsize)) // 8 * 8
    TT = int(max(8, min(tt_cap, _round_up(T, 8), 1024)))
    return TB, TT, False


# --------------------------------------------------------------------------
# Wrapper
# --------------------------------------------------------------------------
def mean_linear(features, weight, bias):
    """features: (B, T, D); weight: (C, D) (PyTorch Linear layout); bias: (C,)."""
    B, T, D = features.shape
    C = weight.shape[0]
    itemsize = jnp.dtype(features.dtype).itemsize

    vmem_cap = _vmem_capacity_bytes()
    vmem_limit_cap = (vmem_cap * 3) // 4            # 48 MiB v7x, 96 MiB v5e/v6e
    feat_budget = min(32 * 1024 * 1024, vmem_limit_cap // 2)

    TB, TT, single_pass = _choose_tiles(B, T, D, itemsize, feat_budget)
    Cp = _round_up(C, 128)                          # lane-dense output stores
    inv_t = 1.0 / float(T)

    # Only the tiny parameter tensors are padded on the host.
    w_t = jnp.pad(weight.T.astype(jnp.float32), ((0, 0), (0, Cp - C)))   # (D, Cp)
    b2 = jnp.pad(bias.astype(jnp.float32).reshape(1, C),
                 ((0, 0), (0, Cp - C)))                                  # (1, Cp)

    # VMEM accounting: feature double-buffer + params + output + accumulator.
    vmem_needed = (2 * TB * TT * D * itemsize
                   + 2 * (D * Cp + Cp + TB * Cp) * 4
                   + TB * D * 4)
    vmem_limit = int(min(vmem_limit_cap,
                         max(32 * 1024 * 1024, int(vmem_needed * 1.3))))

    cost = pl.CostEstimate(
        flops=2 * B * D * C + B * T * D,
        transcendentals=0,
        bytes_accessed=itemsize * B * T * D + 4 * (D * C + C + B * C),
    )

    def run(resident_single_buffer):
        def resident(shape, index_map):
            if resident_single_buffer:
                return pl.BlockSpec(shape, index_map,
                                    pipeline_mode=pl.Buffered(1))
            return pl.BlockSpec(shape, index_map)

        if single_pass:
            grid = (pl.cdiv(B, TB),)
            in_specs = [
                pl.BlockSpec((TB, TT, D), lambda i: (i, 0, 0)),
                resident((D, Cp), lambda i: (0, 0)),
                resident((1, Cp), lambda i: (0, 0)),
            ]
            out_specs = pl.BlockSpec((TB, Cp), lambda i: (i, 0))
            kernel = functools.partial(_single_pass_kernel, inv_t=inv_t)
            scratch = []
            semantics = ("parallel",)
        else:
            grid = (pl.cdiv(B, TB), pl.cdiv(T, TT))
            in_specs = [
                pl.BlockSpec((TB, TT, D), lambda i, t: (i, t, 0)),
                resident((D, Cp), lambda i, t: (0, 0)),
                resident((1, Cp), lambda i, t: (0, 0)),
            ]
            out_specs = pl.BlockSpec((TB, Cp), lambda i, t: (i, 0))
            kernel = functools.partial(_two_pass_kernel, inv_t=inv_t,
                                       t_total=T, tt=TT,
                                       mask_t=(T % TT != 0))
            scratch = [pltpu.VMEM((TB, D), jnp.float32)]
            semantics = ("parallel", "arbitrary")

        return pl.pallas_call(
            kernel,
            out_shape=jax.ShapeDtypeStruct((B, Cp), features.dtype),
            grid_spec=pltpu.PrefetchScalarGridSpec(
                num_scalar_prefetch=0,
                grid=grid,
                in_specs=in_specs,
                out_specs=out_specs,
                scratch_shapes=scratch,
            ),
            compiler_params=pltpu.CompilerParams(
                dimension_semantics=semantics,
                vmem_limit_bytes=vmem_limit,
            ),
            cost_estimate=cost,
        )(features, w_t, b2)

    try:
        out_padded = run(resident_single_buffer=True)
    except Exception:
        # Fallback if this JAX build rejects pipeline_mode=pl.Buffered(1).
        out_padded = run(resident_single_buffer=False)

    return out_padded[:, :C]


if __name__ == "__main__":
    key = jax.random.PRNGKey(0)
    k_x, k_w, k_b = jax.random.split(key, 3)

    # Small shapes consistent with the module: (batch, seq, input_dim) -> classes
    B, T, D, C = 4, 8, 32, 10
    features = jax.random.normal(k_x, (B, T, D), dtype=jnp.float32)
    weight = jax.random.normal(k_w, (C, D), dtype=jnp.float32) * 0.05  # (C, D)
    bias = jax.random.normal(k_b, (C,), dtype=jnp.float32) * 0.05

    out = mean_linear(features, weight, bias)
    out = jax.block_until_ready(out)
    ref = features.mean(axis=1) @ weight.T + bias
    assert out.shape == (B, C)
    assert jnp.allclose(out, ref, atol=1e-5, rtol=1e-5), "mismatch vs reference"

    # Second check: non-tile-aligned batch (exercises the ragged last batch
    # tile with NO host-side padding of the feature tensor).
    B2 = 19
    feats2 = jax.random.normal(k_x, (B2, T, D), dtype=jnp.float32)
    out2 = jax.block_until_ready(mean_linear(feats2, weight, bias))
    ref2 = feats2.mean(axis=1) @ weight.T + bias
    assert out2.shape == (B2, C)
    assert jnp.allclose(out2, ref2, atol=1e-5, rtol=1e-5), "ragged-B mismatch"

    print("KERNEL_OK")
</pallas_src>

<mosaic_0001>
module attributes {stable_mosaic.version = 11 : i64} {
  func.func @_single_pass_kernel(%arg0: i32, %arg1: memref<4x8x32xf32, #tpu.memory_space<vmem>>, %arg2: memref<32x128xf32, #tpu.memory_space<vmem>>, %arg3: memref<1x128xf32, #tpu.memory_space<vmem>>, %arg4: memref<4x128xf32, #tpu.memory_space<vmem>>) attributes {dimension_semantics = [#tpu.dimension_semantics<parallel>], iteration_bounds = array<i64: 1>, scalar_prefetch = 0 : i64, scratch_operands = 0 : i64, tpu.core_type = #tpu.core_type<tc>, window_params = [{transform_indices = @transform_0, window_bounds = array<i64: 4, 8, 32>}, {pipeline_mode = #tpu.pipeline_mode<synchronous>, transform_indices = @transform_1, window_bounds = array<i64: 32, 128>}, {pipeline_mode = #tpu.pipeline_mode<synchronous>, transform_indices = @transform_2, window_bounds = array<i64: 1, 128>}, {transform_indices = @transform_3, window_bounds = array<i64: 4, 128>}]} {
    %c0 = arith.constant 0 : index
    %c0_0 = arith.constant 0 : index
    %c0_1 = arith.constant 0 : index
    %0 = vector.load %arg1[%c0, %c0_0, %c0_1] : memref<4x8x32xf32, #tpu.memory_space<vmem>>, vector<4x8x32xf32>
    %cst = arith.constant dense<0.000000e+00> : vector<4x32xf32>
    %1 = vector.multi_reduction <add>, %0, %cst [1] : vector<4x8x32xf32> to vector<4x32xf32>
    %cst_2 = arith.constant 1.250000e-01 : f32
    %2 = vector.broadcast %cst_2 : f32 to vector<4x32xf32>
    %3 = arith.mulf %1, %2 : vector<4x32xf32>
    %c0_3 = arith.constant 0 : index
    %c0_4 = arith.constant 0 : index
    %4 = vector.load %arg2[%c0_3, %c0_4] : memref<32x128xf32, #tpu.memory_space<vmem>>, vector<32x128xf32>
    %cst_5 = arith.constant dense<0.000000e+00> : vector<4x128xf32>
    %5 = tpu.matmul %3, %4, %cst_5 {dimension_numbers = #tpu.dot_dimension_numbers<[1], [0], [0], [1], [0, 0, 1, 1], [], []>} : vector<4x32xf32>, vector<32x128xf32>, vector<4x128xf32> -> vector<4x128xf32>
    %c0_6 = arith.constant 0 : index
    %c0_7 = arith.constant 0 : index
    %6 = vector.load %arg3[%c0_6, %c0_7] : memref<1x128xf32, #tpu.memory_space<vmem>>, vector<1x128xf32>
    %7 = vector.broadcast %6 : vector<1x128xf32> to vector<4x128xf32>
    %8 = arith.addf %5, %7 : vector<4x128xf32>
    %c0_8 = arith.constant 0 : index
    %c0_9 = arith.constant 0 : index
    %9 = vector.load %arg4[%c0_8, %c0_9] : memref<4x128xf32, #tpu.memory_space<vmem>>, vector<4x128xf32>
    tpu.vector_store %arg4[%c0_8, %c0_9], %8 {strides = array<i32>} : memref<4x128xf32, #tpu.memory_space<vmem>>, vector<4x128xf32>,
    return
  }
  func.func @transform_0(%arg0: i32) -> (i32, i32, i32) {
    %c0_i32 = arith.constant 0 : i32
    %c0_i32_0 = arith.constant 0 : i32
    %c0_i32_1 = arith.constant 0 : i32
    return %arg0, %c0_i32, %c0_i32_0 : i32, i32, i32
  }
  func.func @transform_1(%arg0: i32) -> (i32, i32) {
    %c0_i32 = arith.constant 0 : i32
    %c0_i32_0 = arith.constant 0 : i32
    %c0_i32_1 = arith.constant 0 : i32
    return %c0_i32, %c0_i32_0 : i32, i32
  }
  func.func @transform_2(%arg0: i32) -> (i32, i32) {
    %c0_i32 = arith.constant 0 : i32
    %c0_i32_0 = arith.constant 0 : i32
    %c0_i32_1 = arith.constant 0 : i32
    return %c0_i32, %c0_i32_0 : i32, i32
  }
  func.func @transform_3(%arg0: i32) -> (i32, i32) {
    %c0_i32 = arith.constant 0 : i32
    %c0_i32_0 = arith.constant 0 : i32
    return %arg0, %c0_i32 : i32, i32
  }
}

module attributes {stable_mosaic.version = 11 : i64} {
  func.func @_single_pass_kernel(%arg0: i32, %arg1: memref<4x8x32xf32, #tpu.memory_space<vmem>>, %arg2: memref<32x128xf32, #tpu.memory_space<vmem>>, %arg3: memref<1x128xf32, #tpu.memory_space<vmem>>, %arg4: memref<4x128xf32, #tpu.memory_space<vmem>>) attributes {dimension_semantics = [#tpu.dimension_semantics<parallel>], iteration_bounds = array<i64: 1>, scalar_prefetch = 0 : i64, scratch_operands = 0 : i64, tpu.core_type = #tpu.core_type<tc>, window_params = [{transform_indices = @transform_0, window_bounds = array<i64: 4, 8, 32>}, {pipeline_mode = #tpu.pipeline_mode<synchronous>, transform_indices = @transform_1, window_bounds = array<i64: 32, 128>}, {pipeline_mode = #tpu.pipeline_mode<synchronous>, transform_indices = @transform_2, window_bounds = array<i64: 1, 128>}, {transform_indices = @transform_3, window_bounds = array<i64: 4, 128>}]} {
    %c0 = arith.constant 0 : index
    %c0_0 = arith.constant 0 : index
    %c0_1 = arith.constant 0 : index
    %0 = vector.load %arg1[%c0, %c0_0, %c0_1] : memref<4x8x32xf32, #tpu.memory_space<vmem>>, vector<4x8x32xf32>
    %cst = arith.constant dense<0.000000e+00> : vector<4x32xf32>
    %1 = vector.multi_reduction <add>, %0, %cst [1] : vector<4x8x32xf32> to vector<4x32xf32>
    %cst_2 = arith.constant 1.250000e-01 : f32
    %2 = vector.broadcast %cst_2 : f32 to vector<4x32xf32>
    %3 = arith.mulf %1, %2 : vector<4x32xf32>
    %c0_3 = arith.constant 0 : index
    %c0_4 = arith.constant 0 : index
    %4 = vector.load %arg2[%c0_3, %c0_4] : memref<32x128xf32, #tpu.memory_space<vmem>>, vector<32x128xf32>
    %cst_5 = arith.constant dense<0.000000e+00> : vector<4x128xf32>
    %5 = tpu.matmul %3, %4, %cst_5 {dimension_numbers = #tpu.dot_dimension_numbers<[1], [0], [0], [1], [0, 0, 1, 1], [], []>} : vector<4x32xf32>, vector<32x128xf32>, vector<4x128xf32> -> vector<4x128xf32>
    %c0_6 = arith.constant 0 : index
    %c0_7 = arith.constant 0 : index
    %6 = vector.load %arg3[%c0_6, %c0_7] : memref<1x128xf32, #tpu.memory_space<vmem>>, vector<1x128xf32>
    %7 = vector.broadcast %6 : vector<1x128xf32> to vector<4x128xf32>
    %8 = arith.addf %5, %7 : vector<4x128xf32>
    %c0_8 = arith.constant 0 : index
    %c0_9 = arith.constant 0 : index
    %9 = vector.load %arg4[%c0_8, %c0_9] : memref<4x128xf32, #tpu.memory_space<vmem>>, vector<4x128xf32>
    tpu.vector_store %arg4[%c0_8, %c0_9], %8 {strides = array<i32>} : memref<4x128xf32, #tpu.memory_space<vmem>>, vector<4x128xf32>,
    return
  }
  func.func @transform_0(%arg0: i32) -> (i32, i32, i32) {
    %c0_i32 = arith.constant 0 : i32
    %c0_i32_0 = arith.constant 0 : i32
    %c0_i32_1 = arith.constant 0 : i32
    return %arg0, %c0_i32, %c0_i32_0 : i32, i32, i32
  }
  func.func @transform_1(%arg0: i32) -> (i32, i32) {
    %c0_i32 = arith.constant 0 : i32
    %c0_i32_0 = arith.constant 0 : i32
    %c0_i32_1 = arith.constant 0 : i32
    return %c0_i32, %c0_i32_0 : i32, i32
  }
  func.func @transform_2(%arg0: i32) -> (i32, i32) {
    %c0_i32 = arith.constant 0 : i32
    %c0_i32_0 = arith.constant 0 : i32
    %c0_i32_1 = arith.constant 0 : i32
    return %c0_i32, %c0_i32_0 : i32, i32
  }
  func.func @transform_3(%arg0: i32) -> (i32, i32) {
    %c0_i32 = arith.constant 0 : i32
    %c0_i32_0 = arith.constant 0 : i32
    return %arg0, %c0_i32 : i32, i32
  }
}

</mosaic_0001>

<bundles_post_ra>
// kernel: tpu_custom_call.1
= control target key start
LH: loop header
LB: loop body
LE: loop exit
PB: predicated region body
PF: predicated region fallthrough
CT: control target
= control target key end

     0   :  { %8 = vsyncpa [#allocation3], 0  ;;  %s366_s0 = inlined_call_operand.hbm [shape: f32[4,8,32], index: 0, kind: input, shape index: {}]   ;;  %s367_s1 = inlined_call_operand.hbm [shape: f32[32,128], index: 1, kind: input, shape index: {}]   ;;  %s368_s2 = inlined_call_operand.vmem [shape: f32[1,128], index: 2, kind: input, shape index: {}]   ;;  %s369_s3 = inlined_call_operand.hbm [shape: f32[4,128], index: 3, kind: output, shape index: {}]  }
   0x1   :  { %9 = vsyncpa [#allocation6], 0 }
   0x2   :  { %10 = vsyncpa [#allocation4], 0  ;;  %s294_s12 = smov [#allocation2]   ;;  %s222_s16 = scalar_lea.hbm %s366_s0, 512 }
   0x3   :  { %s16_s13 = sshll.u32 %s294_s12, 4  ;;  %p223_p0 = scmp.ne.s32.totalorder %s366_s0, %s222_s16  ;;  %s17_s13 = int_to_ptr.vmem [resolvable:$true] %s16_s13 }
   0x4   :  { %p226_p1 = scmp.lt.u32.totalorder %s222_s16, %s366_s0 }
   0x6   :  { %p228_p2 = pnand %p226_p1, %p223_p0 }
   0x8   :  { %231 = shalt.err (!%p228_p2)
}
   0x9   :  { %s232_s21 = scalar_lea.vmem %s17_s13, 512  ;;  %p237_p4 = scmp.lt.s32.totalorder %s17_s13, %s17_s13 }
   0xa   :  { %p233_p3 = scmp.ne.s32.totalorder %s17_s13, %s232_s21  ;;  %p238_p5 = scmp.lt.s32.totalorder %s232_s21, %s232_s21 }
   0xc   :  { %p239_p6 = por %p238_p5, %p237_p4 }
   0xe   :  { %p240_p7 = pnand %p239_p6, %p233_p3 }
  0x10   :  { %243 = shalt.err (!%p240_p7)
}
  0x11   :  { %s295_s22 = smov 128   ;;  %s296_s23 = smov 8  }
  0x12   :  { %22 = dma.hbm_to_vmem [thread:$0]  %s366_s0, 512, %s17_s13, [#allocation3], %s295_s22, %s295_s22, %s296_s23  }
  0x13   :  { %s297_s26 = smov [#allocation5]   ;;  %s244_s30 = scalar_lea.hbm %s367_s1, 512 }
  0x14   :  { %s28_s27 = sshll.u32 %s297_s26, 4  ;;  %p245_p8 = scmp.ne.s32.totalorder %s367_s1, %s244_s30  ;;  %s29_s27 = int_to_ptr.vmem [resolvable:$true] %s28_s27 }
  0x15   :  { %p248_p9 = scmp.lt.u32.totalorder %s244_s30, %s367_s1 }
  0x17   :  { %p250_p10 = pnand %p248_p9, %p245_p8 }
  0x19   :  { %253 = shalt.err (!%p250_p10)
}
  0x1a   :  { %s254_s8 = scalar_lea.vmem %s29_s27, 512  ;;  %p259_p12 = scmp.lt.s32.totalorder %s29_s27, %s29_s27 }
  0x1b   :  { %p255_p11 = scmp.ne.s32.totalorder %s29_s27, %s254_s8  ;;  %p260_p13 = scmp.lt.s32.totalorder %s254_s8, %s254_s8 }
  0x1d   :  { %p261_p0 = por %p260_p13, %p259_p12 }
  0x1f   :  { %p262_p1 = pnand %p261_p0, %p255_p11 }
  0x21   :  { %265 = shalt.err (!%p262_p1)
}
  0x22   :  { %34 = dma.hbm_to_vmem [thread:$0]  %s367_s1, 512, %s29_s27, [#allocation6], %s295_s22, %s295_s22, %s296_s23  }
  0x23   :  { %288 = dma.done.wait [#allocation3], 512  }
  0x24   :  { %289 = vsyncadd [#allocation3], 4294966784 }
  0x25   :  { %290 = dma.done.wait [#allocation6], 512  }
  0x26   :  { %291 = vsyncadd [#allocation6], 4294966784  ;;  %v298_v0 = vmov 0.0|0.0   ;;  %vm299_vm0 = vmmov 0   ;;  %v300_v1 = vmov 0.0   ;;  %vm47_vm1 = vcmask 261120  }
  0x27   :  { %208 = vmatprep.subr.bf16.mxu0 %v298_v0  ;;  %205 = vmatprep.mubr.msk.f32.mxu0 %vm299_vm0, %v300_v1  ;;  %v80_v2 = vld [vmem:[#allocation5] sm:$0xff]  ;;  %v81_v3 = vld [vmem:[#allocation5 + $0x8] sm:$0xff]  ;;  %v82_v4 = vld [vmem:[#allocation5 + $0x10] sm:$0xff]  ;;  %vm95_vm2 = vcmask 1041409   ;;  %vm97_vm3 = vcmask 1042434   ;;  %vm99_vm4 = vcmask 1043459  }
  0x28   :  { %v209_v5 = vpack.c.bf16 %v81_v3, %v80_v2  ;;  %v83_v6 = vld [vmem:[#allocation5 + $0x18] sm:$0xff]  ;;  %v43_v7 = vld [vmem:[#allocation2] sm:$0xff]  ;;  %v44_v8 = vld [vmem:[#allocation2 + $0x8] sm:$0xff]  ;;  %s301_s11 = smov [#allocation7]  }
  0x29   :  { %v212_v9 = vpack.c.bf16 %v83_v6, %v82_v4  ;;  %v45_v10 = vld [vmem:[#allocation2 + $0x10] sm:$0xff]  ;;  %v46_v11 = vld [vmem:[#allocation2 + $0x18] sm:$0xff]  ;;  %v48_v12 = vsel %vm47_vm1, %v43_v7, 0.0  ;;  %v55_v13 = vsel %vm47_vm1, %v44_v8, 0.0  ;;  %v190_v47 = vld [vmem:[%s368_s2] ss:$0 sm:$0xff] }
  0x2a   :  { %210 = vmatpush3.bf16.msra.mxu0 %v209_v5  ;;  %v49_v14 = vrot.slane %v48_v12, 4  ;;  %v56_v15 = vrot.slane %v55_v13, 4  ;;  %v62_v16 = vsel %vm47_vm1, %v45_v10, 0.0  ;;  %v69_v17 = vsel %vm47_vm1, %v46_v11, 0.0  ;;  %s180_s12 = sshll.u32 %s301_s11, 4  ;;  %s181_s12 = int_to_ptr.vmem [resolvable:$true] %s180_s12 }
  0x2b   :  { %211 = vmatprep.subr.bf16.mxu0 %v298_v0  ;;  %v63_v18 = vrot.slane %v62_v16, 4  ;;  %v70_v19 = vrot.slane %v69_v17, 4  ;;  %s266_s13 = scalar_lea.vmem %s181_s12, 64  ;;  %p271_p3 = scmp.lt.s32.totalorder %s181_s12, %s181_s12 }
  0x2c   :  { %v50_v20 = vadd.f32 %v49_v14, %v48_v12  ;;  %v57_v21 = vadd.f32 %v56_v15, %v55_v13  ;;  %p267_p2 = scmp.ne.s32.totalorder %s181_s12, %s266_s13  ;;  %p272_p4 = scmp.lt.s32.totalorder %s266_s13, %s266_s13 }
  0x2d   :  { %v64_v22 = vadd.f32 %v63_v18, %v62_v16  ;;  %v71_v23 = vadd.f32 %v70_v19, %v69_v17 }
  0x2e   :  { %213 = vmatpush3.bf16.msra.mxu0 %v212_v9  ;;  %v51_v24 = vrot.slane %v50_v20, 2  ;;  %v58_v25 = vrot.slane %v57_v21, 2  ;;  %p273_p5 = por %p272_p4, %p271_p3 }
  0x2f   :  { %v65_v26 = vrot.slane %v64_v22, 2  ;;  %v72_v27 = vrot.slane %v71_v23, 2 }
  0x30   :  { %v52_v28 = vadd.f32 %v51_v24, %v50_v20  ;;  %v59_v29 = vadd.f32 %v58_v25, %v57_v21  ;;  %p274_p6 = pnand %p273_p5, %p267_p2 }
  0x31   :  { %v66_v30 = vadd.f32 %v65_v26, %v64_v22  ;;  %v73_v31 = vadd.f32 %v72_v27, %v71_v23 }
  0x32   :  { %v53_v32 = vrot.slane %v52_v28, 1  ;;  %v60_v33 = vrot.slane %v59_v29, 1 }
  0x33   :  { %v67_v34 = vrot.slane %v66_v30, 1  ;;  %v74_v35 = vrot.slane %v73_v31, 1 }
  0x34   :  { %v54_v36 = vadd.f32 %v53_v32, %v52_v28  ;;  %v61_v37 = vadd.f32 %v60_v33, %v59_v29 }
  0x35   :  { %v68_v38 = vadd.f32 %v67_v34, %v66_v30  ;;  %v75_v39 = vadd.f32 %v74_v35, %v73_v31 }
  0x36   :  { %v76_v40 = vmul.f32 0.125, %v54_v36  ;;  %v77_v41 = vmul.f32 0.125, %v61_v37 }
  0x37   :  { %v78_v42 = vmul.f32 0.125, %v68_v38  ;;  %v79_v43 = vmul.f32 0.125, %v75_v39 }
  0x38   :  { %v96_v44 = vsel %vm95_vm2, %v77_v41, %v76_v40 }
  0x39   :  { %v98_v45 = vsel %vm97_vm3, %v78_v42, %v96_v44 }
  0x3a   :  { %v100_v46 = vsel %vm99_vm4, %v79_v43, %v98_v45 }
  0x3b   :  { %206 = vmatmul.mubr.msk.f32.vlgmr.msra.gmra.mrb[0].mxu0 %vm47_vm1, %v100_v46 }
 0x10e   :  { %v169_v48 = vpop.f32.mrb[0].mxu0 }
 0x10f   :  { %v170_v49 = vadd.f32 %v190_v47, %v169_v48  ;;  %v207_v50 = vpop.f32.mrb[1].mxu0 }
 0x111   :  { %173 = vst [vmem:[#allocation7] sm:$0xf] %v170_v49 }
 0x112   :  { %277 = shalt.err (!%p274_p6)
}
 0x113   :  { %s278_s16 = scalar_lea.hbm %s369_s3, 64 }
 0x114   :  { %p279_p7 = scmp.ne.s32.totalorder %s369_s3, %s278_s16  ;;  %p282_p8 = scmp.lt.u32.totalorder %s278_s16, %s369_s3 }
 0x116   :  { %p284_p9 = pnand %p282_p8, %p279_p7 }
 0x118   :  { %287 = shalt.err (!%p284_p9)
}
 0x119   :  { %183 = dma.vmem_to_hbm [thread:$0]  %s181_s12, 64, %s369_s3, [#allocation4]  }
 0x11a   :  { %292 = dma.done.wait [#allocation4], 64  }
 0x11b   :  { %293 = vsyncadd [#allocation4], 4294967232 }
 0x11c   :  { %187 = vsyncpa [#allocation3], 1 }
 0x11d   :  { %188 = vsyncpa [#allocation6], 1 }
 0x11e   :  { %189 = vsyncpa [#allocation4], 1 }

// kernel: tpu_custom_call.1
= control target key start
LH: loop header
LB: loop body
LE: loop exit
PB: predicated region body
PF: predicated region fallthrough
CT: control target
= control target key end

     0   :  { %8 = vsyncpa [#allocation3], 0  ;;  %s366_s0 = inlined_call_operand.hbm [shape: f32[4,8,32], index: 0, kind: input, shape index: {}]   ;;  %s367_s1 = inlined_call_operand.hbm [shape: f32[32,128], index: 1, kind: input, shape index: {}]   ;;  %s368_s2 = inlined_call_operand.vmem [shape: f32[1,128], index: 2, kind: input, shape index: {}]   ;;  %s369_s3 = inlined_call_operand.hbm [shape: f32[4,128], index: 3, kind: output, shape index: {}]  }
   0x1   :  { %9 = vsyncpa [#allocation6], 0 }
   0x2   :  { %10 = vsyncpa [#allocation4], 0  ;;  %s294_s12 = smov [#allocation2]   ;;  %s222_s16 = scalar_lea.hbm %s366_s0, 512 }
   0x3   :  { %s16_s13 = sshll.u32 %s294_s12, 4  ;;  %p223_p0 = scmp.ne.s32.totalorder %s366_s0, %s222_s16  ;;  %s17_s13 = int_to_ptr.vmem [resolvable:$true] %s16_s13 }
   0x4   :  { %p226_p1 = scmp.lt.u32.totalorder %s222_s16, %s366_s0 }
   0x6   :  { %p228_p2 = pnand %p226_p1, %p223_p0 }
   0x8   :  { %231 = shalt.err (!%p228_p2)
}
   0x9   :  { %s232_s21 = scalar_lea.vmem %s17_s13, 512  ;;  %p237_p4 = scmp.lt.s32.totalorder %s17_s13, %s17_s13 }
   0xa   :  { %p233_p3 = scmp.ne.s32.totalorder %s17_s13, %s232_s21  ;;  %p238_p5 = scmp.lt.s32.totalorder %s232_s21, %s232_s21 }
   0xc   :  { %p239_p6 = por %p238_p5, %p237_p4 }
   0xe   :  { %p240_p7 = pnand %p239_p6, %p233_p3 }
  0x10   :  { %243 = shalt.err (!%p240_p7)
}
  0x11   :  { %s295_s22 = smov 128   ;;  %s296_s23 = smov 8  }
  0x12   :  { %22 = dma.hbm_to_vmem [thread:$0]  %s366_s0, 512, %s17_s13, [#allocation3], %s295_s22, %s295_s22, %s296_s23  }
  0x13   :  { %s297_s26 = smov [#allocation5]   ;;  %s244_s30 = scalar_lea.hbm %s367_s1, 512 }
  0x14   :  { %s28_s27 = sshll.u32 %s297_s26, 4  ;;  %p245_p8 = scmp.ne.s32.totalorder %s367_s1, %s244_s30  ;;  %s29_s27 = int_to_ptr.vmem [resolvable:$true] %s28_s27 }
  0x15   :  { %p248_p9 = scmp.lt.u32.totalorder %s244_s30, %s367_s1 }
  0x17   :  { %p250_p10 = pnand %p248_p9, %p245_p8 }
  0x19   :  { %253 = shalt.err (!%p250_p10)
}
  0x1a   :  { %s254_s8 = scalar_lea.vmem %s29_s27, 512  ;;  %p259_p12 = scmp.lt.s32.totalorder %s29_s27, %s29_s27 }
  0x1b   :  { %p255_p11 = scmp.ne.s32.totalorder %s29_s27, %s254_s8  ;;  %p260_p13 = scmp.lt.s32.totalorder %s254_s8, %s254_s8 }
  0x1d   :  { %p261_p0 = por %p260_p13, %p259_p12 }
  0x1f   :  { %p262_p1 = pnand %p261_p0, %p255_p11 }
  0x21   :  { %265 = shalt.err (!%p262_p1)
}
  0x22   :  { %34 = dma.hbm_to_vmem [thread:$0]  %s367_s1, 512, %s29_s27, [#allocation6], %s295_s22, %s295_s22, %s296_s23  }
  0x23   :  { %288 = dma.done.wait [#allocation3], 512  }
  0x24   :  { %289 = vsyncadd [#allocation3], 4294966784 }
  0x25   :  { %290 = dma.done.wait [#allocation6], 512  }
  0x26   :  { %291 = vsyncadd [#allocation6], 4294966784  ;;  %v298_v0 = vmov 0.0|0.0   ;;  %vm299_vm0 = vmmov 0   ;;  %v300_v1 = vmov 0.0   ;;  %vm47_vm1 = vcmask 261120  }
  0x27   :  { %208 = vmatprep.subr.bf16.mxu0 %v298_v0  ;;  %205 = vmatprep.mubr.msk.f32.mxu0 %vm299_vm0, %v300_v1  ;;  %v80_v2 = vld [vmem:[#allocation5] sm:$0xff]  ;;  %v81_v3 = vld [vmem:[#allocation5 + $0x8] sm:$0xff]  ;;  %v82_v4 = vld [vmem:[#allocation5 + $0x10] sm:$0xff]  ;;  %vm95_vm2 = vcmask 1041409   ;;  %vm97_vm3 = vcmask 1042434   ;;  %vm99_vm4 = vcmask 1043459  }
  0x28   :  { %v209_v5 = vpack.c.bf16 %v81_v3, %v80_v2  ;;  %v83_v6 = vld [vmem:[#allocation5 + $0x18] sm:$0xff]  ;;  %v43_v7 = vld [vmem:[#allocation2] sm:$0xff]  ;;  %v44_v8 = vld [vmem:[#allocation2 + $0x8] sm:$0xff]  ;;  %s301_s11 = smov [#allocation7]  }
  0x29   :  { %v212_v9 = vpack.c.bf16 %v83_v6, %v82_v4  ;;  %v45_v10 = vld [vmem:[#allocation2 + $0x10] sm:$0xff]  ;;  %v46_v11 = vld [vmem:[#allocation2 + $0x18] sm:$0xff]  ;;  %v48_v12 = vsel %vm47_vm1, %v43_v7, 0.0  ;;  %v55_v13 = vsel %vm47_vm1, %v44_v8, 0.0  ;;  %v190_v47 = vld [vmem:[%s368_s2] ss:$0 sm:$0xff] }
  0x2a   :  { %210 = vmatpush3.bf16.msra.mxu0 %v209_v5  ;;  %v49_v14 = vrot.slane %v48_v12, 4  ;;  %v56_v15 = vrot.slane %v55_v13, 4  ;;  %v62_v16 = vsel %vm47_vm1, %v45_v10, 0.0  ;;  %v69_v17 = vsel %vm47_vm1, %v46_v11, 0.0  ;;  %s180_s12 = sshll.u32 %s301_s11, 4  ;;  %s181_s12 = int_to_ptr.vmem [resolvable:$true] %s180_s12 }
  0x2b   :  { %211 = vmatprep.subr.bf16.mxu0 %v298_v0  ;;  %v63_v18 = vrot.slane %v62_v16, 4  ;;  %v70_v19 = vrot.slane %v69_v17, 4  ;;  %s266_s13 = scalar_lea.vmem %s181_s12, 64  ;;  %p271_p3 = scmp.lt.s32.totalorder %s181_s12, %s181_s12 }
  0x2c   :  { %v50_v20 = vadd.f32 %v49_v14, %v48_v12  ;;  %v57_v21 = vadd.f32 %v56_v15, %v55_v13  ;;  %p267_p2 = scmp.ne.s32.totalorder %s181_s12, %s266_s13  ;;  %p272_p4 = scmp.lt.s32.totalorder %s266_s13, %s266_s13 }
  0x2d   :  { %v64_v22 = vadd.f32 %v63_v18, %v62_v16  ;;  %v71_v23 = vadd.f32 %v70_v19, %v69_v17 }
  0x2e   :  { %213 = vmatpush3.bf16.msra.mxu0 %v212_v9  ;;  %v51_v24 = vrot.slane %v50_v20, 2  ;;  %v58_v25 = vrot.slane %v57_v21, 2  ;;  %p273_p5 = por %p272_p4, %p271_p3 }
  0x2f   :  { %v65_v26 = vrot.slane %v64_v22, 2  ;;  %v72_v27 = vrot.slane %v71_v23, 2 }
  0x30   :  { %v52_v28 = vadd.f32 %v51_v24, %v50_v20  ;;  %v59_v29 = vadd.f32 %v58_v25, %v57_v21  ;;  %p274_p6 = pnand %p273_p5, %p267_p2 }
  0x31   :  { %v66_v30 = vadd.f32 %v65_v26, %v64_v22  ;;  %v73_v31 = vadd.f32 %v72_v27, %v71_v23 }
  0x32   :  { %v53_v32 = vrot.slane %v52_v28, 1  ;;  %v60_v33 = vrot.slane %v59_v29, 1 }
  0x33   :  { %v67_v34 = vrot.slane %v66_v30, 1  ;;  %v74_v35 = vrot.slane %v73_v31, 1 }
  0x34   :  { %v54_v36 = vadd.f32 %v53_v32, %v52_v28  ;;  %v61_v37 = vadd.f32 %v60_v33, %v59_v29 }
  0x35   :  { %v68_v38 = vadd.f32 %v67_v34, %v66_v30  ;;  %v75_v39 = vadd.f32 %v74_v35, %v73_v31 }
  0x36   :  { %v76_v40 = vmul.f32 0.125, %v54_v36  ;;  %v77_v41 = vmul.f32 0.125, %v61_v37 }
  0x37   :  { %v78_v42 = vmul.f32 0.125, %v68_v38  ;;  %v79_v43 = vmul.f32 0.125, %v75_v39 }
  0x38   :  { %v96_v44 = vsel %vm95_vm2, %v77_v41, %v76_v40 }
  0x39   :  { %v98_v45 = vsel %vm97_vm3, %v78_v42, %v96_v44 }
  0x3a   :  { %v100_v46 = vsel %vm99_vm4, %v79_v43, %v98_v45 }
  0x3b   :  { %206 = vmatmul.mubr.msk.f32.vlgmr.msra.gmra.mrb[0].mxu0 %vm47_vm1, %v100_v46 }
 0x10e   :  { %v169_v48 = vpop.f32.mrb[0].mxu0 }
 0x10f   :  { %v170_v49 = vadd.f32 %v190_v47, %v169_v48  ;;  %v207_v50 = vpop.f32.mrb[1].mxu0 }
 0x111   :  { %173 = vst [vmem:[#allocation7] sm:$0xf] %v170_v49 }
 0x112   :  { %277 = shalt.err (!%p274_p6)
}
 0x113   :  { %s278_s16 = scalar_lea.hbm %s369_s3, 64 }
 0x114   :  { %p279_p7 = scmp.ne.s32.totalorder %s369_s3, %s278_s16  ;;  %p282_p8 = scmp.lt.u32.totalorder %s278_s16, %s369_s3 }
 0x116   :  { %p284_p9 = pnand %p282_p8, %p279_p7 }
 0x118   :  { %287 = shalt.err (!%p284_p9)
}
 0x119   :  { %183 = dma.vmem_to_hbm [thread:$0]  %s181_s12, 64, %s369_s3, [#allocation4]  }
 0x11a   :  { %292 = dma.done.wait [#allocation4], 64  }
 0x11b   :  { %293 = vsyncadd [#allocation4], 4294967232 }
 0x11c   :  { %187 = vsyncpa [#allocation3], 1 }
 0x11d   :  { %188 = vsyncpa [#allocation6], 1 }
 0x11e   :  { %189 = vsyncpa [#allocation4], 1 }

</bundles_post_ra>
